<compile_context>
chip_gen: v5e
topology: v5e:2x2
jax: 0.10.0
libtpu: 0.0.40
codegen_flags: <defaults>
</compile_context>

<pallas_src>
import jax
import jax.numpy as jnp
from jax.experimental import pallas as pl
from jax.experimental.pallas import tpu as pltpu

_PACK = 4  # batch rows packed per vreg row (4 * D=32 -> full 128-lane rows)


def _round_up(x, m):
    return ((x + m - 1) // m) * m


def init_discriminator_params(weight, bias, pack=_PACK):
    """One-time parameter setup (kept OUT of the per-call path).

    weight: [1, D]  (PyTorch nn.Linear(D, 1) layout)
    bias:   [1]
    """
    d = weight.shape[1]
    w_t = jnp.asarray(weight).reshape(d, 1)                       # [D, 1] for XLA fallback
    # Block-diagonal weight: w_blk[g*D + k, g] = weight[0, k].
    w_blk = jnp.kron(jnp.eye(pack, dtype=weight.dtype), w_t)      # [pack*D, pack]
    b_row = jnp.tile(jnp.asarray(bias).reshape(1, 1), (1, pack))  # [1, pack]
    return {
        "w_t": w_t,
        "b": jnp.asarray(bias).reshape(1, 1),
        "w_blk": w_blk,
        "b_row": b_row,
        "pack": pack,
        "dim": d,
    }


def _discriminator_kernel(x_ref, w_ref, b_ref, o_ref):
    # x_ref: [TBp, pack*D], w_ref: [pack*D, pack], b_ref: [1, pack], o_ref: [TBp, pack]
    # MXU matmul with f32 accumulation; operands fed in native dtype.
    logits = jnp.dot(x_ref[...], w_ref[...], preferred_element_type=jnp.float32)
    logits = logits + b_ref[...].astype(jnp.float32)
    # sigmoid = 1 / (1 + exp(-z)); exp goes to the EUP, exact reciprocal keeps
    # fp32 accuracy (1e-5 tolerance).
    probs = pl.reciprocal(1.0 + jnp.exp(-logits), approx=False)
    o_ref[...] = probs.astype(o_ref.dtype)


def discriminator_forward(mol_feature, params, *, reverse=False,
                          tile_rows=8192, min_pallas_batch=2048,
                          force_pallas=False):
    """sigmoid(mol_feature @ W.T + b).  mol_feature: [B, D] -> [B, 1]."""
    # TODO(synk): GradientReverseLayer backward (-0.1*coeff*grad) and the
    # global_step / aToBSheduler coeff schedule are backward/training-only
    # mechanics; the forward pass is identity, so `reverse` is a no-op here.
    del reverse

    B, D = mol_feature.shape
    pack = params["pack"]

    # Small-batch fallback: pallas_call launch + per-step overhead dwarfs the
    # ~KBs of HBM traffic at these sizes; one fused XLA matmul+sigmoid wins.
    if B < min_pallas_batch and not force_pallas:
        return jax.nn.sigmoid(mol_feature @ params["w_t"] + params["b"])

    # Pack `pack` batch rows per vreg row (free row-major view after padding).
    b_pad = _round_up(B, pack)
    x = mol_feature
    if b_pad != B:
        x = jnp.pad(x, ((0, b_pad - B), (0, 0)))
    bp = b_pad // pack
    kp = pack * D
    x_packed = x.reshape(bp, kp)

    # Packed-row tile: big tiles amortize the fixed per-step pipeline cost;
    # keep >=2 grid steps when possible so both v7x TensorCores get work.
    if bp <= 8:
        tbp = bp                                   # full-extent block (tiny forced case)
    else:
        tbp = max(8, (tile_rows // pack) // 8 * 8)
        half = _round_up(pl.cdiv(bp, 2), 8)
        tbp = min(tbp, half)

    grid = (pl.cdiv(bp, tbp),)

    out_packed = pl.pallas_call(
        _discriminator_kernel,
        out_shape=jax.ShapeDtypeStruct((bp, pack), mol_feature.dtype),
        grid_spec=pltpu.PrefetchScalarGridSpec(
            num_scalar_prefetch=0,
            grid=grid,
            in_specs=[
                pl.BlockSpec((tbp, kp), lambda i: (i, 0)),    # batch-tiled packed x
                pl.BlockSpec((kp, pack), lambda i: (0, 0)),   # resident block-diag W
                pl.BlockSpec((1, pack), lambda i: (0, 0)),    # resident bias row
            ],
            out_specs=pl.BlockSpec((tbp, pack), lambda i: (i, 0)),
        ),
        compiler_params=pltpu.CompilerParams(
            dimension_semantics=("parallel",)),
    )(x_packed, params["w_blk"], params["b_row"])

    # [bp, pack] row-major == [b_pad, 1]; drop padding rows.
    return out_packed.reshape(b_pad, 1)[:B]


if __name__ == "__main__":
    fingerprint_dim = 32

    key = jax.random.PRNGKey(0)
    k_w, k_b, k_x1, k_x2 = jax.random.split(key, 4)

    # Parameters in PyTorch nn.Linear(fingerprint_dim, 1) layout.
    weight = jax.random.normal(k_w, (1, fingerprint_dim), dtype=jnp.float32) * 0.1
    bias = jax.random.normal(k_b, (1,), dtype=jnp.float32) * 0.1
    params = init_discriminator_params(weight, bias)

    def ref_fn(x):
        return jax.nn.sigmoid(x @ weight.T + bias)

    # 1) Small batch: takes the XLA fallback path (the common case).
    x_small = jax.random.normal(k_x1, (8, fingerprint_dim), dtype=jnp.float32)
    out_small = jax.block_until_ready(discriminator_forward(x_small, params))
    assert out_small.shape == (8, 1)
    assert jnp.allclose(out_small, ref_fn(x_small), atol=1e-5, rtol=1e-5), "fallback mismatch"

    # 2) Pallas path (forced); batch not a multiple of pack/tile so this also
    #    exercises padding, a partial last tile, and a multi-step grid.
    x_big = jax.random.normal(k_x2, (70, fingerprint_dim), dtype=jnp.float32)
    out_big = jax.block_until_ready(
        discriminator_forward(x_big, params, force_pallas=True))
    assert out_big.shape == (70, 1)
    assert jnp.allclose(out_big, ref_fn(x_big), atol=1e-5, rtol=1e-5), "pallas mismatch"

    # 3) reverse=True path (GRL is identity in forward).
    out_rev = jax.block_until_ready(
        discriminator_forward(x_big, params, reverse=True, force_pallas=True))
    assert jnp.allclose(out_rev, ref_fn(x_big), atol=1e-5, rtol=1e-5), "reverse mismatch"

    print("KERNEL_OK")
</pallas_src>

<mosaic_0001>
module attributes {stable_mosaic.version = 11 : i64} {
  func.func @_discriminator_kernel(%arg0: i32, %arg1: memref<16x128xf32, #tpu.memory_space<vmem>>, %arg2: memref<128x4xf32, #tpu.memory_space<vmem>>, %arg3: memref<1x4xf32, #tpu.memory_space<vmem>>, %arg4: memref<16x4xf32, #tpu.memory_space<vmem>>) attributes {dimension_semantics = [#tpu.dimension_semantics<parallel>], iteration_bounds = array<i64: 2>, scalar_prefetch = 0 : i64, scratch_operands = 0 : i64, tpu.core_type = #tpu.core_type<tc>, window_params = [{transform_indices = @transform_0, window_bounds = array<i64: 16, 128>}, {pipeline_mode = #tpu.pipeline_mode<synchronous>, transform_indices = @transform_1, window_bounds = array<i64: 128, 4>}, {pipeline_mode = #tpu.pipeline_mode<synchronous>, transform_indices = @transform_2, window_bounds = array<i64: 1, 4>}, {transform_indices = @transform_3, window_bounds = array<i64: 16, 4>}]} {
    %c0 = arith.constant 0 : index
    %c0_0 = arith.constant 0 : index
    %0 = vector.load %arg1[%c0, %c0_0] : memref<16x128xf32, #tpu.memory_space<vmem>>, vector<16x128xf32>
    %c0_1 = arith.constant 0 : index
    %c0_2 = arith.constant 0 : index
    %1 = vector.load %arg2[%c0_1, %c0_2] : memref<128x4xf32, #tpu.memory_space<vmem>>, vector<128x4xf32>
    %cst = arith.constant dense<0.000000e+00> : vector<16x4xf32>
    %2 = tpu.matmul %0, %1, %cst {dimension_numbers = #tpu.dot_dimension_numbers<[1], [0], [0], [1], [0, 0, 1, 1], [], []>} : vector<16x128xf32>, vector<128x4xf32>, vector<16x4xf32> -> vector<16x4xf32>
    %c0_3 = arith.constant 0 : index
    %c0_4 = arith.constant 0 : index
    %3 = vector.load %arg3[%c0_3, %c0_4] : memref<1x4xf32, #tpu.memory_space<vmem>>, vector<1x4xf32>
    %4 = vector.broadcast %3 : vector<1x4xf32> to vector<16x4xf32>
    %5 = arith.addf %2, %4 : vector<16x4xf32>
    %cst_5 = arith.constant 0.000000e+00 : f32
    %6 = vector.broadcast %cst_5 : f32 to vector<16x4xf32>
    %7 = arith.subf %6, %5 : vector<16x4xf32>
    %8 = math.exp %7 : vector<16x4xf32>
    %cst_6 = arith.constant 1.000000e+00 : f32
    %9 = vector.broadcast %cst_6 : f32 to vector<16x4xf32>
    %10 = arith.addf %9, %8 : vector<16x4xf32>
    %11 = tpu.reciprocal %10 : vector<16x4xf32> -> vector<16x4xf32>
    %c0_7 = arith.constant 0 : index
    %c0_8 = arith.constant 0 : index
    %12 = vector.load %arg4[%c0_7, %c0_8] : memref<16x4xf32, #tpu.memory_space<vmem>>, vector<16x4xf32>
    tpu.vector_store %arg4[%c0_7, %c0_8], %11 {strides = array<i32>} : memref<16x4xf32, #tpu.memory_space<vmem>>, vector<16x4xf32>,
    return
  }
  func.func @transform_0(%arg0: i32) -> (i32, i32) {
    %c0_i32 = arith.constant 0 : i32
    %c0_i32_0 = arith.constant 0 : i32
    return %arg0, %c0_i32 : i32, i32
  }
  func.func @transform_1(%arg0: i32) -> (i32, i32) {
    %c0_i32 = arith.constant 0 : i32
    %c0_i32_0 = arith.constant 0 : i32
    %c0_i32_1 = arith.constant 0 : i32
    return %c0_i32, %c0_i32_0 : i32, i32
  }
  func.func @transform_2(%arg0: i32) -> (i32, i32) {
    %c0_i32 = arith.constant 0 : i32
    %c0_i32_0 = arith.constant 0 : i32
    %c0_i32_1 = arith.constant 0 : i32
    return %c0_i32, %c0_i32_0 : i32, i32
  }
  func.func @transform_3(%arg0: i32) -> (i32, i32) {
    %c0_i32 = arith.constant 0 : i32
    %c0_i32_0 = arith.constant 0 : i32
    return %arg0, %c0_i32 : i32, i32
  }
}

</mosaic_0001>

<bundles_post_ra>
// kernel: tpu_custom_call.1
= control target key start
LH: loop header
LB: loop body
LE: loop exit
PB: predicated region body
PF: predicated region fallthrough
CT: control target
= control target key end

     0   :  { %s744_s12 = smov 0   ;;  %s746_s13 = smov 0   ;;  %s878_s0 = inlined_call_operand.vmem [shape: f32[18,128], index: 0, kind: input, shape index: {}]   ;;  %s879_s1 = inlined_call_operand.vmem [shape: f32[128,4], index: 1, kind: input, shape index: {}]   ;;  %s880_s2 = inlined_call_operand.vmem [shape: f32[1,4], index: 2, kind: input, shape index: {}]   ;;  %s881_s3 = inlined_call_operand.vmem [shape: f32[18,4], index: 3, kind: output, shape index: {}]  }
   0x1   :  { %s748_s14 = smov 0  }
   0x2 LB: > { %s757_s15 = sadd.s32 4294967295, %s690_s14   ;;  %s759_s16 = sadd.s32 1, %s690_s14   ;;  %s690_s14 = sphi %s748_s14, %s885_s14   ;;  %s686_s13 = sphi %s746_s13, %s884_s13   ;;  %s682_s12 = sphi %s744_s12, %s883_s12  }
   0x3   : > { %s85_s17 = ssub.s32 %s690_s14, %s759_s16  ;;  %s88_s18 = sadd.s32 1, %s686_s13 }
   0x4   : > { %p86_p0 = scmp.eq.s32.totalorder %s85_s17, 0  ;;  %p98_p1 = scmp.ne.s32.totalorder %s686_s13, %s682_s12 }
   0x5   : > { %p99_p2 = scmp.eq.s32.totalorder %s757_s15, 1  ;;  %p499_p3 = scmp.ge.s32.totalorder %s690_s14, 1 }
   0x6   : > { %s767_s19 = scalar_select %p86_p0, %s686_s13, %s88_s18  }
   0x7   : > { %p769_p4 = por %p99_p2, %p98_p1  ;;  %p146_p5 = scmp.lt.s32.totalorder %s690_s14, 3 }
   0x9   : > { %p147_p6 = pnand %p499_p3, %p146_p5 }
   0xa   : > { %s798_s10 = sshll.u32 (!%p147_p6), %s757_s15, 1  ;;  %s170_s18 = sand.u32 (!%p147_p6), 1, %s682_s12  }
   0xb   : > { %150 = sbr.rel (%p147_p6) target bundleno = 247 (0xf7), region = 32  ;;  %p178_p7 = scmp.lt.s32.totalorder (!%p147_p6), %s798_s10, 2 }
   0xc   : > { %s500_s21 = sshll.u32 (!%p147_p6), %s170_s18, 4 }
   0xd   : > { %s833_s12 = scalar_lea.vmem (!%p147_p6), [#allocation2], %s500_s21  }
  0x10   : > { %v209_v0 = vld [vmem:[%s879_s1 + $0x78] sm:$0xff]  ;;  %v208_v1 = vld [vmem:[%s879_s1 + $0x70] sm:$0xff]  ;;  %v207_v2 = vld [vmem:[%s879_s1 + $0x68] sm:$0xff]  ;;  %s179_s23 = scalar_select %p178_p7, %s798_s10, 2  ;;  %vm273_vm4 = vcmask 31744  }
  0x11   : > { %214 = vmatpush.msra.mxu0 %v209_v0  ;;  %523 = vmatpush.msra.mxu1 %v209_v0  ;;  %v206_v3 = vld [vmem:[%s879_s1 + $0x60] sm:$0xff]  ;;  %v205_v4 = vld [vmem:[%s879_s1 + $0x58] sm:$0xff]  ;;  %v204_v5 = vld [vmem:[%s879_s1 + $0x50] sm:$0xff]  ;;  %s284_s22 = ssub.s32 (%p769_p4), 3, %s798_s10 }
  0x12   : > { %v203_v6 = vld [vmem:[%s879_s1 + $0x48] sm:$0xff]  ;;  %v202_v7 = vld [vmem:[%s879_s1 + $0x40] sm:$0xff]  ;;  %v201_v8 = vld [vmem:[%s879_s1 + $0x38] sm:$0xff]  ;;  %s502_s28 = sshll.u32 %s179_s23, 3  ;;  %s520_s23 = sshll.u32 (%p769_p4), %s757_s15, 4 }
  0x13   : > { %215 = vmatpush.msra.mxu0 %v208_v1  ;;  %524 = vmatpush.msra.mxu1 %v208_v1  ;;  %v200_v9 = vld [vmem:[%s879_s1 + $0x30] sm:$0xff]  ;;  %v199_v10 = vld [vmem:[%s879_s1 + $0x28] sm:$0xff]  ;;  %v198_v11 = vld [vmem:[%s879_s1 + $0x20] sm:$0xff]  ;;  %s181_s8 = scalar_lea.vmem %s878_s0, %s502_s28  ;;  %p285_p8 = scmp.lt.s32.totalorder (%p769_p4), %s284_s22, 2 }
  0x14   : > { %v197_v12 = vld [vmem:[%s879_s1 + $0x18] sm:$0xff]  ;;  %v196_v13 = vld [vmem:[%s879_s1 + $0x10] sm:$0xff]  ;;  %v195_v14 = vld [vmem:[%s879_s1 + $0x8] sm:$0xff]  ;;  %s844_s26 = scalar_lea.vmem (%p769_p4), %s881_s3, %s520_s23  }
  0x15   : > { %216 = vmatpush.msra.mxu0 %v207_v2  ;;  %525 = vmatpush.msra.mxu1 %v207_v2  ;;  %v194_v15 = vld [vmem:[%s879_s1] sm:$0xff]  ;;  %v193_v17 = vld [vmem:[%s181_s8 + $0x8] sm:$0xff] }
  0x16   : > { %v192_v16 = vld [vmem:[%s181_s8] sm:$0xff] }
  0x17   : > { %217 = vmatpush.msra.mxu0 %v206_v3  ;;  %526 = vmatpush.msra.mxu1 %v206_v3  ;;  %v627_v18 = vld [vmem:[%s880_s2] ss:$0 sm:$0xff] }
  0x19   : > { %218 = vmatpush.msra.mxu0 %v205_v4  ;;  %527 = vmatpush.msra.mxu1 %v205_v4 }
  0x1b   : > { %219 = vmatpush.msra.mxu0 %v204_v5  ;;  %528 = vmatpush.msra.mxu1 %v204_v5 }
  0x1d   : > { %220 = vmatpush.msra.mxu0 %v203_v6  ;;  %529 = vmatpush.msra.mxu1 %v203_v6 }
  0x1f   : > { %221 = vmatpush.msra.mxu0 %v202_v7  ;;  %530 = vmatpush.msra.mxu1 %v202_v7 }
  0x21   : > { %222 = vmatpush.msra.mxu0 %v201_v8  ;;  %531 = vmatpush.msra.mxu1 %v201_v8 }
  0x23   : > { %223 = vmatpush.msra.mxu0 %v200_v9  ;;  %532 = vmatpush.msra.mxu1 %v200_v9 }
  0x25   : > { %224 = vmatpush.msra.mxu0 %v199_v10  ;;  %533 = vmatpush.msra.mxu1 %v199_v10 }
  0x27   : > { %225 = vmatpush.msra.mxu0 %v198_v11  ;;  %534 = vmatpush.msra.mxu1 %v198_v11 }
  0x29   : > { %226 = vmatpush.msra.mxu0 %v197_v12  ;;  %535 = vmatpush.msra.mxu1 %v197_v12 }
  0x2b   : > { %227 = vmatpush.msra.mxu0 %v196_v13  ;;  %536 = vmatpush.msra.mxu1 %v196_v13 }
  0x2d   : > { %228 = vmatpush.msra.mxu0 %v195_v14  ;;  %537 = vmatpush.msra.mxu1 %v195_v14 }
  0x2f   : > { %229 = vmatpush.msra.mxu0 %v194_v15  ;;  %538 = vmatpush.msra.mxu1 %v194_v15 }
  0x30   : > { %230 = vmatmul.f32.vlgmr.msra.gmra.mxu0 %v192_v16  ;;  %233 = vmatmul.f32.vlgmr.msra.gmra.mxu1 %v193_v17 }
  0xad   : > { %v231_v19 = vpop.f32.mrf.mxu0  ;;  %v234_v20 = vpop.f32.mrf.mxu1 }
  0xae   : > { %v232_v21 = vadd.f32 %v627_v18, %v231_v19  ;;  %v235_v22 = vadd.f32 %v627_v18, %v234_v20 }
  0xb0   : > { %v237_v23 = vsub.f32 0.0, %v232_v21  ;;  %v238_v24 = vsub.f32 0.0, %v235_v22 }
  0xb2   : > { %v239_v25 = vmul.f32 1.442695, %v237_v23  ;;  %v241_v26 = vmul.f32 1.442695, %v238_v24 }
  0xb4   : > { %628 = vpow2.f32 %v239_v25 }
  0xb5   : > { %630 = vpow2.f32 %v241_v26 }
  0xba   : > { %v629_v27 = vpop.eup %628 }
  0xbb   : > { %v631_v28 = vpop.eup %630  ;;  %v243_v29 = vadd.f32 1.0, %v629_v27 }
  0xbc   : > { %v244_v30 = vadd.f32 1.0, %v631_v28 }
  0xbd   : > { %632 = vrcp.f32 %v243_v29  ;;  %v256_v36 = vand.u32 2147483648, %v243_v29  ;;  %v254_v39 = vand.u32 2147483647, %v243_v29  ;;  %vm250_vm2 = vweird.f32 %v243_v29 }
  0xbe   : > { %634 = vrcp.f32 %v244_v30  ;;  %v270_v40 = vand.u32 2147483648, %v244_v30  ;;  %v268_v42 = vand.u32 2147483647, %v244_v30  ;;  %vm264_vm5 = vweird.f32 %v244_v30 }
  0xbf   : > { %v257_v44 = vor.u32 1.1754944e-38, %v256_v36  ;;  %vm255_vm6 = vcmp.eq.f32.partialorder %v254_v39, 8.507059e+37 }
  0xc0   : > { %v271_v47 = vor.u32 1.1754944e-38, %v270_v40  ;;  %vm269_vm8 = vcmp.eq.f32.partialorder %v268_v42, 8.507059e+37 }
  0xc3   : > { %v633_v31 = vpop.eup %632 }
  0xc4   : > { %v635_v32 = vpop.eup %634  ;;  %v246_v33 = vmul.f32 %v633_v31, %v243_v29  ;;  %vm251_vm0 = vweird.f32 %v633_v31 }
  0xc5   : > { %v260_v34 = vmul.f32 %v635_v32, %v244_v30  ;;  %vm265_vm1 = vweird.f32 %v635_v32  ;;  %vm252_vm3 = vmor %vm250_vm2, %vm251_vm0 }
  0xc6   : > { %v247_v35 = vsub.f32 1.0, %v246_v33  ;;  %vm266_vm7 = vmor %vm264_vm5, %vm265_vm1 }
  0xc7   : > { %v261_v37 = vsub.f32 1.0, %v260_v34 }
  0xc8   : > { %v248_v38 = vmul.f32 %v633_v31, %v247_v35 }
  0xc9   : > { %v262_v41 = vmul.f32 %v635_v32, %v261_v37 }
  0xca   : > { %v249_v43 = vadd.f32 %v633_v31, %v248_v38 }
  0xcb   : > { %v263_v45 = vadd.f32 %v635_v32, %v262_v41  ;;  %282 = sbr.rel (!%p769_p4) target bundleno = 247 (0xf7), region = 36 }
  0xcc   : > { %v253_v46 = vsel %vm252_vm3, %v633_v31, %v249_v43 }
  0xcd   : > { %v258_v48 = vsel %vm255_vm6, %v257_v44, %v253_v46  ;;  %v267_v49 = vsel %vm266_vm7, %v635_v32, %v263_v45 }
  0xce   : > { %274 = vst.msk [vmem:[%s833_s12] sm:$0xff] %vm273_vm4, %v258_v48  ;;  %v272_v50 = vsel %vm269_vm8, %v271_v47, %v267_v49 }
  0xcf   : > { %275 = vst.msk [vmem:[%s833_s12 + $0x8] sm:$0xff] %vm273_vm4, %v272_v50 }
  0xd0   : > { %s887_s22 = smov (!%p285_p8, %s284_s22), 2 }
  0xd1   : > { %s505_s27 = sshll.u32 %s887_s22, 3 }
  0xd2   : > { %p508_p9 = scmp.eq.s32.totalorder %s505_s27, 0 }
  0xd3   : > { %s850_s28 = sshrl.u32 (!%p508_p9), %s887_s22, 1 }
  0xd4   : > { %293 = sbr.rel (%p508_p9) target bundleno = 247 (0xf7), region = 40  ;;  %p509_p10 = scmp.le.s32.totalorder (!%p508_p9), %s850_s28, 0 }
  0xd9   : > { %452 = sbr.rel (%p509_p10) target bundleno = 230 (0xe6), region = 116  ;;  %s692_s15 = smov (!%p509_p10), %s844_s26  }
  0xda   : > { %s696_s20 = smov (!%p509_p10), %s833_s12   ;;  %s700_s10 = smov (!%p509_p10), 0  }
  0xdb   : > { %s704_s29 = smov (!%p509_p10), 0  }
  0xde LB: >> { %v358_v51 = vld [vmem:[%s698_s20] sm:$0xff]  ;;  %v360_v52 = vld [vmem:[%s698_s20 + $0x8] sm:$0xff]  ;;  %s362_s30 = sadd.s32 1, %s702_s10  ;;  %s352_s29 = sadd.s32 1, %s706_s29   ;;  %s706_s29 = sphi %s704_s29, %s352_s29   ;;  %s702_s10 = sphi %s700_s10, %s701_s10   ;;  %s698_s20 = sphi %s696_s20, %s367_s20   ;;  %s694_s15 = sphi %s692_s15, %s368_s15  }
  0xdf   : >> { %359 = vst [vmem:[%s694_s15] sm:$0xff] %v358_v51  ;;  %p363_p11 = scmp.ge.s32.totalorder %s362_s30, %s850_s28  ;;  %p351_p12 = scmp.ge.s32.totalorder %s352_s29, %s850_s28 }
  0xe0   : >> { %361 = vst [vmem:[%s694_s15 + $0x8] sm:$0xff] %v360_v52 }
  0xe1   : >> { %s889_s30 = smov (%p363_p11, %s362_s30), 0  ;;  %354 = sbr.rel (!%p351_p12) target bundleno = 222 (0xde), region = 122 }
  0xe2   : >> { %s510_s4 = sshll.u32 %s889_s30, 4  ;;  %s701_s10 = smov %s889_s30  }
  0xe3   : >> { %s367_s20 = scalar_lea.vmem %s833_s12, %s510_s4 [#allocation2]   ;;  %s368_s15 = scalar_lea.vmem %s844_s26, %s510_s4  }
  0xe6 PF: > { %s860_s5 = sand.u32 1, %s887_s22   ;;  %s521_s6 = sshll.u32 %s850_s28, 4 }
  0xe7   : > { %s373_s7 = scalar_lea.vmem %s833_s12, %s521_s6 [#allocation2]   ;;  %s375_s8 = scalar_lea.vmem %s844_s26, %s521_s6  }
  0xe8   : > { %p515_p13 = scmp.le.s32.totalorder %s860_s5, 0 }
  0xe9   : > { %s708_s9 = smov (!%p515_p13), %s375_s8   ;;  %s712_s11 = smov (!%p515_p13), %s373_s7  }
  0xea   : > { %466 = sbr.rel (%p515_p13) target bundleno = 247 (0xf7), region = 127  ;;  %s716_s14 = smov (!%p515_p13), 0  }
  0xeb   : > { %s720_s17 = smov (!%p515_p13), 0  }
  0xef LB: >> { %v385_v53 = vld [vmem:[%s714_s11] sm:$0xff]  ;;  %s387_s18 = sadd.s32 1, %s718_s14  ;;  %s379_s17 = sadd.s32 1, %s722_s17   ;;  %s722_s17 = sphi %s720_s17, %s379_s17   ;;  %s718_s14 = sphi %s716_s14, %s717_s14   ;;  %s714_s11 = sphi %s712_s11, %s392_s11   ;;  %s710_s9 = sphi %s708_s9, %s393_s9  }
  0xf0   : >> { %386 = vst [vmem:[%s710_s9] sm:$0xff] %v385_v53  ;;  %p388_p0 = scmp.ge.s32.totalorder %s387_s18, %s860_s5  ;;  %p378_p1 = scmp.ge.s32.totalorder %s379_s17, %s860_s5 }
  0xf2   : >> { %s891_s18 = smov (%p388_p0, %s387_s18), 0  ;;  %381 = sbr.rel (!%p378_p1) target bundleno = 239 (0xef), region = 133 }
  0xf3   : >> { %s516_s21 = sshll.u32 %s891_s18, 3  ;;  %s717_s14 = smov %s891_s18  }
  0xf4   : >> { %s392_s11 = scalar_lea.vmem %s373_s7, %s516_s21 [#allocation2]   ;;  %s393_s9 = scalar_lea.vmem %s375_s8, %s516_s21  }
  0xf7 PF: > { %p10_p2 = scmp.ge.s32.totalorder %s759_s16, 4   ;;  %s883_s12 = smov %s686_s13 }
  0xf8   : > { %s884_s13 = smov %s767_s19  ;;  %s885_s14 = smov %s759_s16 }
  0xf9   :  { %12 = sbr.rel (!%p10_p2) target bundleno = 2 (0x2), region = 144 }

</bundles_post_ra>
